<compile_context>
chip_gen: v5e
topology: v5e:2x2
jax: 0.10.0
libtpu: 0.0.40
codegen_flags: <defaults>
</compile_context>

<pallas_src>
import jax
import jax.numpy as jnp
from jax.experimental import pallas as pl
from jax.experimental.pallas import tpu as pltpu

IN_CHANNELS = 3
OUT_CHANNELS = 128

# Row-tile cap.  VMEM at tm=2048 (f32):
#   x tile  (2048,3) lane-padded -> (2048,128): 1 MiB  x2 buffers = 2 MiB
#   out tile (2048,128):                        1 MiB  x2 buffers = 2 MiB
#   weights (8,128)+(128,128):                 ~68 KiB x2 buffers
#   intermediates v1..v4 (2048,128) f32:       ~2-3 MiB (compiler-reused)
#   total ~6-8 MiB  -> fits v5e 16 MiB scoped default and v6e/v7x 32 MiB.
DEFAULT_TM_CAP = 2048
# Above this many rows, force >= 2 grid steps so both v7x TensorCores get work.
MEGACORE_SPLIT_ROWS = 2048


def _round_up(x, n):
    return ((x + n - 1) // n) * n


def _sigmoid(v):
    # EUP tanh path; mathematically identical to 1/(1+exp(-v)).
    return 0.5 * jnp.tanh(0.5 * v) + 0.5


def _mlp_kernel(x_ref, w1_ref, w2_ref, o_ref, *, use_bf16_mxu):
    # x_ref:  (tm, C_in)     VMEM tile of flattened input rows
    # w1_ref: (C_in, C_out)  full weight 1, already (in, out) layout
    # w2_ref: (C_out, C_out) full weight 2, already (in, out) layout
    # o_ref:  (tm, C_out)
    x = x_ref[...].astype(jnp.float32)
    w1 = w1_ref[...].astype(jnp.float32)
    c_in = x.shape[1]

    if c_in <= 8:
        # Tiny contraction dim: broadcast FMAs on the VPU, keep the MXU free
        # for the real (tm,128)x(128,128) matmul below.
        v1 = x[:, 0:1] * w1[0:1, :]
        for k in range(1, c_in):
            v1 = v1 + x[:, k:k + 1] * w1[k:k + 1, :]
    else:
        v1 = jnp.dot(x, w1, preferred_element_type=jnp.float32)

    v2 = _sigmoid(v1)

    if use_bf16_mxu:
        # Single-pass bf16 MXU matmul (~3x fewer MXU cycles than f32); only
        # enabled when the caller accepts ~1e-3 relative error.
        v3 = jnp.dot(v2.astype(jnp.bfloat16),
                     w2_ref[...].astype(jnp.bfloat16),
                     preferred_element_type=jnp.float32)
    else:
        v3 = jnp.dot(v2, w2_ref[...].astype(jnp.float32),
                     preferred_element_type=jnp.float32)

    v4 = _sigmoid(v3)
    o_ref[...] = v4.astype(o_ref.dtype)


def _choose_tile(m, tm_cap):
    """Pick the row-tile size.

    - small M: a single tile (grid=(1,)), rounded up to a sublane multiple.
    - M >= MEGACORE_SPLIT_ROWS: guarantee >= 2 grid steps so v7x's two
      TensorCores can both be used (harmless extra step on 1-TC v5e/v6e),
      while capping the tile at tm_cap so the double-buffered VMEM footprint
      stays within every generation's scoped default.
    """
    if m < MEGACORE_SPLIT_ROWS:
        if m <= tm_cap:
            return max(_round_up(m, 8), 8)
        return tm_cap
    half = _round_up(pl.cdiv(m, 2), 8)
    return min(half, tm_cap)


def model_forward(x, w1_t, w2_t, *, tm_cap=DEFAULT_TM_CAP,
                  use_bf16_mxu=False, out_dtype=None):
    """sigmoid(sigmoid(x @ w1_t) @ w2_t).

    x: (..., C_in); w1_t: (C_in, C_out); w2_t: (C_out, C_out) — weights are
    already transposed relative to PyTorch's (out, in) Linear layout, so this
    matches Model.forward exactly.

    Optional perf knobs (both default to exact-f32 semantics):
      use_bf16_mxu: run the 128x128 contraction in bf16 (MXU single pass).
      out_dtype:    e.g. jnp.bfloat16 to halve the dominant HBM writeback.
    """
    orig_shape = x.shape
    c_in = orig_shape[-1]
    c_out = w1_t.shape[1]
    x2d = x.reshape(-1, c_in)
    m = x2d.shape[0]
    if out_dtype is None:
        out_dtype = x.dtype

    tm_eff = _choose_tile(m, tm_cap)
    grid = (pl.cdiv(m, tm_eff),)   # ragged final block is masked by Pallas —
                                   # no pad/slice HBM copies in the wrapper.

    kernel = lambda xr, w1r, w2r, orr: _mlp_kernel(
        xr, w1r, w2r, orr, use_bf16_mxu=use_bf16_mxu)

    out = pl.pallas_call(
        kernel,
        out_shape=jax.ShapeDtypeStruct((m, c_out), out_dtype),
        grid_spec=pltpu.PrefetchScalarGridSpec(
            num_scalar_prefetch=0,
            grid=grid,
            in_specs=[
                pl.BlockSpec((tm_eff, c_in), lambda i: (i, 0)),
                pl.BlockSpec((c_in, c_out), lambda i: (0, 0)),
                pl.BlockSpec((c_out, c_out), lambda i: (0, 0)),
            ],
            out_specs=pl.BlockSpec((tm_eff, c_out), lambda i: (i, 0)),
        ),
        compiler_params=pltpu.CompilerParams(
            dimension_semantics=("parallel",),
        ),
    )(x2d, w1_t, w2_t)

    return out.reshape(*orig_shape[:-1], c_out)


def init_params(key, in_channels, out_channels):
    """PyTorch-Linear-like uniform init, stored directly in (in, out) layout
    so no per-call transpose is ever needed."""
    k1, k2 = jax.random.split(key)
    bound1 = 1.0 / jnp.sqrt(float(in_channels))
    bound2 = 1.0 / jnp.sqrt(float(out_channels))
    w1_t = jax.random.uniform(
        k1, (in_channels, out_channels), jnp.float32, -bound1, bound1
    )
    w2_t = jax.random.uniform(
        k2, (out_channels, out_channels), jnp.float32, -bound2, bound2
    )
    return w1_t, w2_t


if __name__ == "__main__":
    key = jax.random.PRNGKey(0)
    kx, kp = jax.random.split(key)

    # Last axis matches in_features=3 (the Linear contract); leading dims
    # follow the reference x1 = (3, 8, 12, *)  ->  M = 288 rows, single tile.
    x = jax.random.normal(kx, (3, 8, 12, IN_CHANNELS), dtype=jnp.float32)
    w1_t, w2_t = init_params(kp, IN_CHANNELS, OUT_CHANNELS)

    out = model_forward(x, w1_t, w2_t)
    out = jax.block_until_ready(out)

    # Pure-JAX reference (weights already transposed -> plain matmuls).
    ref = jax.nn.sigmoid(jax.nn.sigmoid(x @ w1_t) @ w2_t)
    assert out.shape == (3, 8, 12, OUT_CHANNELS), out.shape
    assert jnp.allclose(out, ref, atol=2e-5, rtol=2e-5), "mismatch vs reference"

    print("KERNEL_OK")
</pallas_src>

<mosaic_0001>
module attributes {stable_mosaic.version = 11 : i64} {
  func.func @_lambda_(%arg0: i32, %arg1: memref<288x3xf32, #tpu.memory_space<vmem>>, %arg2: memref<3x128xf32, #tpu.memory_space<vmem>>, %arg3: memref<128x128xf32, #tpu.memory_space<vmem>>, %arg4: memref<288x128xf32, #tpu.memory_space<vmem>>) attributes {dimension_semantics = [#tpu.dimension_semantics<parallel>], iteration_bounds = array<i64: 1>, scalar_prefetch = 0 : i64, scratch_operands = 0 : i64, tpu.core_type = #tpu.core_type<tc>, window_params = [{transform_indices = @transform_0, window_bounds = array<i64: 288, 3>}, {pipeline_mode = #tpu.pipeline_mode<synchronous>, transform_indices = @transform_1, window_bounds = array<i64: 3, 128>}, {pipeline_mode = #tpu.pipeline_mode<synchronous>, transform_indices = @transform_2, window_bounds = array<i64: 128, 128>}, {transform_indices = @transform_3, window_bounds = array<i64: 288, 128>}]} {
    %c0 = arith.constant 0 : index
    %c0_0 = arith.constant 0 : index
    %0 = vector.load %arg1[%c0, %c0_0] : memref<288x3xf32, #tpu.memory_space<vmem>>, vector<288x3xf32>
    %c0_1 = arith.constant 0 : index
    %c0_2 = arith.constant 0 : index
    %1 = vector.load %arg2[%c0_1, %c0_2] : memref<3x128xf32, #tpu.memory_space<vmem>>, vector<3x128xf32>
    %2 = vector.extract_strided_slice %0 {offsets = [0, 0], sizes = [288, 1], strides = [1, 1]} : vector<288x3xf32> to vector<288x1xf32>
    %3 = vector.extract_strided_slice %1 {offsets = [0, 0], sizes = [1, 128], strides = [1, 1]} : vector<3x128xf32> to vector<1x128xf32>
    %4 = vector.broadcast %2 : vector<288x1xf32> to vector<288x128xf32>
    %5 = vector.broadcast %3 : vector<1x128xf32> to vector<288x128xf32>
    %6 = arith.mulf %4, %5 : vector<288x128xf32>
    %7 = vector.extract_strided_slice %0 {offsets = [0, 1], sizes = [288, 1], strides = [1, 1]} : vector<288x3xf32> to vector<288x1xf32>
    %8 = vector.extract_strided_slice %1 {offsets = [1, 0], sizes = [1, 128], strides = [1, 1]} : vector<3x128xf32> to vector<1x128xf32>
    %9 = vector.broadcast %7 : vector<288x1xf32> to vector<288x128xf32>
    %10 = vector.broadcast %8 : vector<1x128xf32> to vector<288x128xf32>
    %11 = arith.mulf %9, %10 : vector<288x128xf32>
    %12 = arith.addf %6, %11 : vector<288x128xf32>
    %13 = vector.extract_strided_slice %0 {offsets = [0, 2], sizes = [288, 1], strides = [1, 1]} : vector<288x3xf32> to vector<288x1xf32>
    %14 = vector.extract_strided_slice %1 {offsets = [2, 0], sizes = [1, 128], strides = [1, 1]} : vector<3x128xf32> to vector<1x128xf32>
    %15 = vector.broadcast %13 : vector<288x1xf32> to vector<288x128xf32>
    %16 = vector.broadcast %14 : vector<1x128xf32> to vector<288x128xf32>
    %17 = arith.mulf %15, %16 : vector<288x128xf32>
    %18 = arith.addf %12, %17 : vector<288x128xf32>
    %cst = arith.constant 5.000000e-01 : f32
    %19 = vector.broadcast %cst : f32 to vector<288x128xf32>
    %20 = arith.mulf %19, %18 : vector<288x128xf32>
    %21 = math.tanh %20 : vector<288x128xf32>
    %cst_3 = arith.constant 5.000000e-01 : f32
    %22 = vector.broadcast %cst_3 : f32 to vector<288x128xf32>
    %23 = arith.mulf %22, %21 : vector<288x128xf32>
    %cst_4 = arith.constant 5.000000e-01 : f32
    %24 = vector.broadcast %cst_4 : f32 to vector<288x128xf32>
    %25 = arith.addf %23, %24 : vector<288x128xf32>
    %c0_5 = arith.constant 0 : index
    %c0_6 = arith.constant 0 : index
    %26 = vector.load %arg3[%c0_5, %c0_6] : memref<128x128xf32, #tpu.memory_space<vmem>>, vector<128x128xf32>
    %cst_7 = arith.constant dense<0.000000e+00> : vector<288x128xf32>
    %27 = tpu.matmul %25, %26, %cst_7 {dimension_numbers = #tpu.dot_dimension_numbers<[1], [0], [0], [1], [0, 0, 1, 1], [], []>} : vector<288x128xf32>, vector<128x128xf32>, vector<288x128xf32> -> vector<288x128xf32>
    %cst_8 = arith.constant 5.000000e-01 : f32
    %28 = vector.broadcast %cst_8 : f32 to vector<288x128xf32>
    %29 = arith.mulf %28, %27 : vector<288x128xf32>
    %30 = math.tanh %29 : vector<288x128xf32>
    %cst_9 = arith.constant 5.000000e-01 : f32
    %31 = vector.broadcast %cst_9 : f32 to vector<288x128xf32>
    %32 = arith.mulf %31, %30 : vector<288x128xf32>
    %cst_10 = arith.constant 5.000000e-01 : f32
    %33 = vector.broadcast %cst_10 : f32 to vector<288x128xf32>
    %34 = arith.addf %32, %33 : vector<288x128xf32>
    %c0_11 = arith.constant 0 : index
    %c0_12 = arith.constant 0 : index
    %35 = vector.load %arg4[%c0_11, %c0_12] : memref<288x128xf32, #tpu.memory_space<vmem>>, vector<288x128xf32>
    tpu.vector_store %arg4[%c0_11, %c0_12], %34 {strides = array<i32>} : memref<288x128xf32, #tpu.memory_space<vmem>>, vector<288x128xf32>,
    return
  }
  func.func @transform_0(%arg0: i32) -> (i32, i32) {
    %c0_i32 = arith.constant 0 : i32
    %c0_i32_0 = arith.constant 0 : i32
    return %arg0, %c0_i32 : i32, i32
  }
  func.func @transform_1(%arg0: i32) -> (i32, i32) {
    %c0_i32 = arith.constant 0 : i32
    %c0_i32_0 = arith.constant 0 : i32
    %c0_i32_1 = arith.constant 0 : i32
    return %c0_i32, %c0_i32_0 : i32, i32
  }
  func.func @transform_2(%arg0: i32) -> (i32, i32) {
    %c0_i32 = arith.constant 0 : i32
    %c0_i32_0 = arith.constant 0 : i32
    %c0_i32_1 = arith.constant 0 : i32
    return %c0_i32, %c0_i32_0 : i32, i32
  }
  func.func @transform_3(%arg0: i32) -> (i32, i32) {
    %c0_i32 = arith.constant 0 : i32
    %c0_i32_0 = arith.constant 0 : i32
    return %arg0, %c0_i32 : i32, i32
  }
}

</mosaic_0001>

<bundles_post_ra>
// kernel: tpu_custom_call.1
= control target key start
LH: loop header
LB: loop body
LE: loop exit
PB: predicated region body
PF: predicated region fallthrough
CT: control target
= control target key end

     0   :  { %v1429_v3 = vmov 0   ;;  %s2124_s0 = inlined_call_operand.vmem [shape: f32[288,3], index: 0, kind: input, shape index: {}]   ;;  %s2125_s1 = inlined_call_operand.vmem [shape: f32[3,128], index: 1, kind: input, shape index: {}]   ;;  %s2126_s2 = inlined_call_operand.vmem [shape: f32[128,128], index: 2, kind: input, shape index: {}]   ;;  %s2127_s3 = inlined_call_operand.hbm [shape: f32[288,128], index: 3, kind: output, shape index: {}]  }
   0x1   :  { %v1458_v0 = vld [vmem:[%s2124_s0 + $0x20] sm:$0xff]  ;;  %v1463_v1 = vld [vmem:[%s2124_s0 + $0x10] sm:$0xff]  ;;  %1242 = vset.pattern.permute.xlu2 %v1429_v3  ;;  %1241 = vset.pattern.permute.xlu1 %v1429_v3 }
   0x2   :  { %v1468_v2 = vld [vmem:[%s2124_s0] sm:$0xff]  ;;  %1240 = vset.pattern.permute.xlu0 %v1429_v3  ;;  %74 = vperm.xlu2 %1242, %v1458_v0  }
   0x3   :  { %64 = vperm.xlu1 %1241, %v1463_v1   ;;  %54 = vperm.xlu0 %1240, %v1468_v2  }
   0x4   :  { %8 = vsyncpa [#allocation3], 0  ;;  %v1476_v4 = vld [vmem:[%s2124_s0 + $0x28] sm:$0xff]  ;;  %v1481_v5 = vld [vmem:[%s2124_s0 + $0x18] sm:$0xff]  ;;  %v2128_v38 = vmov 1   ;;  %v2130_v62 = vmov 2  }
   0x5   :  { %v1486_v6 = vld [vmem:[%s2124_s0 + $0x8] sm:$0xff]  ;;  %v1494_v7 = vld [vmem:[%s2124_s0 + $0x40] sm:$0xff]  ;;  %v1499_v8 = vld [vmem:[%s2124_s0 + $0x38] sm:$0xff]  ;;  %s1174_s9 = sshll.u32 %s2127_s3, 4  ;;  %s1433_s10 = smov 128   ;;  %s1175_s9 = int_to_ptr.hbm [resolvable:$true] %s1174_s9 }
   0x6   :  { %2137 = vst [vmem:[#allocation5_spill] sm:$0xff] %v1499_v8  ;;  %v1504_v9 = vld [vmem:[%s2124_s0 + $0x30] sm:$0xff]  ;;  %v1512_v10 = vld [vmem:[%s2124_s0 + $0x58] sm:$0xff]  ;;  %v1522_v12 = vld [vmem:[%s2124_s0 + $0x48] sm:$0xff]  ;;  %s1434_s11 = smov 8  }
   0x7   :  { %v1517_v11 = vld [vmem:[%s2124_s0 + $0x50] sm:$0xff]  ;;  %v1535_v14 = vld [vmem:[%s2124_s0 + $0x68] sm:$0xff]  ;;  %v1540_v15 = vld [vmem:[%s2124_s0 + $0x60] sm:$0xff] }
   0x8   :  { %v1530_v13 = vld [vmem:[%s2124_s0 + $0x70] sm:$0xff]  ;;  %v1548_v16 = vld [vmem:[%s2124_s0 + $0x88] sm:$0xff]  ;;  %v1553_v17 = vld [vmem:[%s2124_s0 + $0x80] sm:$0xff] }
   0x9   :  { %2138 = vst [vmem:[#allocation6_spill] sm:$0xff] %v1548_v16  ;;  %v1558_v18 = vld [vmem:[%s2124_s0 + $0x78] sm:$0xff]  ;;  %v1566_v19 = vld [vmem:[%s2124_s0 + $0xa0] sm:$0xff]  ;;  %v1576_v21 = vld [vmem:[%s2124_s0 + $0x90] sm:$0xff] }
   0xa   :  { %79 = vperm.xlu2 %1242, %v1476_v4   ;;  %2139 = vst [vmem:[#allocation7_spill] sm:$0xff] %v1553_v17  ;;  %v1571_v20 = vld [vmem:[%s2124_s0 + $0x98] sm:$0xff]  ;;  %v1589_v23 = vld [vmem:[%s2124_s0 + $0xb0] sm:$0xff]  ;;  %v1594_v24 = vld [vmem:[%s2124_s0 + $0xa8] sm:$0xff] }
   0xb   :  { %69 = vperm.xlu1 %1241, %v1481_v5   ;;  %59 = vperm.xlu0 %1240, %v1486_v6   ;;  %v1584_v22 = vld [vmem:[%s2124_s0 + $0xb8] sm:$0xff]  ;;  %v1602_v25 = vld [vmem:[%s2124_s0 + $0xd0] sm:$0xff]  ;;  %v1607_v26 = vld [vmem:[%s2124_s0 + $0xc8] sm:$0xff] }
   0xc   :  { %2140 = vst [vmem:[#allocation8_spill] sm:$0xff] %v1602_v25  ;;  %v1612_v27 = vld [vmem:[%s2124_s0 + $0xc0] sm:$0xff]  ;;  %v1620_v28 = vld [vmem:[%s2124_s0 + $0xe8] sm:$0xff]  ;;  %v1630_v30 = vld [vmem:[%s2124_s0 + $0xd8] sm:$0xff] }
   0xd   :  { %2141 = vst [vmem:[#allocation9_spill] sm:$0xff] %v1607_v26  ;;  %v1625_v29 = vld [vmem:[%s2124_s0 + $0xe0] sm:$0xff]  ;;  %v1643_v32 = vld [vmem:[%s2124_s0 + $0xf8] sm:$0xff]  ;;  %v1648_v33 = vld [vmem:[%s2124_s0 + $0xf0] sm:$0xff] }
   0xe   :  { %v1638_v31 = vld [vmem:[%s2124_s0 + $0x100] sm:$0xff]  ;;  %v1656_v34 = vld [vmem:[%s2124_s0 + $0x118] sm:$0xff]  ;;  %v1661_v35 = vld [vmem:[%s2124_s0 + $0x110] sm:$0xff] }
   0xf   :  { %v1666_v36 = vld [vmem:[%s2124_s0 + $0x108] sm:$0xff] }
  0x12   :  { %94 = vperm.xlu2 %1242, %v1494_v7  }
  0x13   :  { %89 = vperm.xlu1 %1241, %v1499_v8   ;;  %84 = vperm.xlu0 %1240, %v1504_v9  }
  0x1a   :  { %109 = vperm.xlu2 %1242, %v1512_v10  }
  0x1b   :  { %104 = vperm.xlu1 %1241, %v1517_v11   ;;  %99 = vperm.xlu0 %1240, %v1522_v12  }
  0x22   :  { %124 = vperm.xlu2 %1242, %v1530_v13  }
  0x23   :  { %119 = vperm.xlu1 %1241, %v1535_v14   ;;  %114 = vperm.xlu0 %1240, %v1540_v15  }
  0x2a   :  { %139 = vperm.xlu2 %1242, %v1548_v16  }
  0x2b   :  { %134 = vperm.xlu1 %1241, %v1553_v17   ;;  %129 = vperm.xlu0 %1240, %v1558_v18  }
  0x32   :  { %154 = vperm.xlu2 %1242, %v1566_v19  }
  0x33   :  { %149 = vperm.xlu1 %1241, %v1571_v20   ;;  %144 = vperm.xlu0 %1240, %v1576_v21  }
  0x3a   :  { %169 = vperm.xlu2 %1242, %v1584_v22  }
  0x3b   :  { %164 = vperm.xlu1 %1241, %v1589_v23   ;;  %159 = vperm.xlu0 %1240, %v1594_v24  }
  0x42   :  { %184 = vperm.xlu2 %1242, %v1602_v25  }
  0x43   :  { %179 = vperm.xlu1 %1241, %v1607_v26   ;;  %174 = vperm.xlu0 %1240, %v1612_v27  }
  0x4a   :  { %199 = vperm.xlu2 %1242, %v1620_v28  }
  0x4b   :  { %194 = vperm.xlu1 %1241, %v1625_v29   ;;  %189 = vperm.xlu0 %1240, %v1630_v30  }
  0x52   :  { %214 = vperm.xlu2 %1242, %v1638_v31  }
  0x53   :  { %209 = vperm.xlu1 %1241, %v1643_v32   ;;  %204 = vperm.xlu0 %1240, %v1648_v33  }
  0x5a   :  { %229 = vperm.xlu2 %1242, %v1656_v34  }
  0x5b   :  { %224 = vperm.xlu1 %1241, %v1661_v35   ;;  %219 = vperm.xlu0 %1240, %v1666_v36  }
  0x5c   :  { %v1671_v37 = vpop.permute.xlu2 %74 }
  0x62   :  { %1245 = vset.pattern.permute.xlu2 %v2128_v38 }
  0x63   :  { %1244 = vset.pattern.permute.xlu1 %v2128_v38  ;;  %1243 = vset.pattern.permute.xlu0 %v2128_v38 }
  0x64   :  { %278 = vperm.xlu2 %1245, %v1463_v1   ;;  %274 = vperm.xlu1 %1244, %v1486_v6   ;;  %v1678_v39 = vpop.permute.xlu2 %79 }
  0x65   :  { %270 = vperm.xlu0 %1243, %v1468_v2  }
  0x6c   :  { %286 = vperm.xlu2 %1245, %v1458_v0   ;;  %282 = vperm.xlu1 %1244, %v1481_v5   ;;  %v1683_v40 = vpop.permute.xlu2 %94 }
  0x6d   :  { %290 = vperm.xlu0 %1243, %v1476_v4  }
  0x74   :  { %298 = vperm.xlu2 %1245, %v1499_v8   ;;  %294 = vperm.xlu1 %1244, %v1504_v9   ;;  %v1688_v41 = vpop.permute.xlu2 %109 }
  0x75   :  { %302 = vperm.xlu0 %1243, %v1494_v7   ;;  %v1691_v42 = vpop.permute.xlu1 %64  ;;  %v1693_v43 = vpop.permute.xlu0 %54 }
  0x7c   :  { %310 = vperm.xlu2 %1245, %v1517_v11   ;;  %306 = vperm.xlu1 %1244, %v1522_v12   ;;  %v1697_v44 = vpop.permute.xlu2 %124 }
  0x7d   :  { %314 = vperm.xlu0 %1243, %v1512_v10   ;;  %v1700_v45 = vpop.permute.xlu1 %69  ;;  %v1702_v46 = vpop.permute.xlu0 %59 }
  0x84   :  { %322 = vperm.xlu2 %1245, %v1535_v14   ;;  %318 = vperm.xlu1 %1244, %v1540_v15   ;;  %v1706_v47 = vpop.permute.xlu2 %139 }
  0x85   :  { %326 = vperm.xlu0 %1243, %v1530_v13   ;;  %v1709_v48 = vpop.permute.xlu1 %89  ;;  %v1711_v49 = vpop.permute.xlu0 %84 }
  0x8c   :  { %334 = vperm.xlu2 %1245, %v1553_v17   ;;  %330 = vperm.xlu1 %1244, %v1558_v18   ;;  %v1715_v50 = vpop.permute.xlu2 %154 }
  0x8d   :  { %2142 = vst [vmem:[#allocation10_spill] sm:$0xff] %v1715_v50  ;;  %338 = vperm.xlu0 %1243, %v1548_v16   ;;  %v1718_v51 = vpop.permute.xlu1 %104  ;;  %v1720_v52 = vpop.permute.xlu0 %99 }
  0x8e   :  { %2143 = vst [vmem:[#allocation11_spill] sm:$0xff] %v1720_v52 }
  0x94   :  { %346 = vperm.xlu2 %1245, %v1571_v20   ;;  %342 = vperm.xlu1 %1244, %v1576_v21   ;;  %v1724_v53 = vpop.permute.xlu2 %169 }
  0x95   :  { %350 = vperm.xlu0 %1243, %v1566_v19   ;;  %v1727_v54 = vpop.permute.xlu1 %119  ;;  %v1729_v55 = vpop.permute.xlu0 %114 }
  0x9c   :  { %358 = vperm.xlu2 %1245, %v1589_v23   ;;  %354 = vperm.xlu1 %1244, %v1594_v24   ;;  %v1733_v56 = vpop.permute.xlu2 %184 }
  0x9d   :  { %2144 = vst [vmem:[#allocation12_spill] sm:$0xff] %v1733_v56  ;;  %362 = vperm.xlu0 %1243, %v1584_v22   ;;  %v1736_v57 = vpop.permute.xlu1 %134  ;;  %v1738_v58 = vpop.permute.xlu0 %129 }
  0xa4   :  { %370 = vperm.xlu2 %1245, %v1607_v26   ;;  %366 = vperm.xlu1 %1244, %v1612_v27   ;;  %v1742_v59 = vpop.permute.xlu2 %199 }
  0xa5   :  { %2145 = vst [vmem:[#allocation13_spill] sm:$0xff] %v1742_v59  ;;  %374 = vperm.xlu0 %1243, %v1602_v25   ;;  %v1745_v60 = vpop.permute.xlu1 %149  ;;  %v1747_v61 = vpop.permute.xlu0 %144 }
  0xac   :  { %1246 = vset.pattern.permute.xlu2 %v2130_v62  ;;  %378 = vperm.xlu1 %1244, %v1630_v30   ;;  %v1751_v63 = vpop.permute.xlu2 %214 }
  0xad   :  { %2146 = vst [vmem:[#allocation14_spill] sm:$0xff] %v1751_v63  ;;  %390 = vperm.xlu0 %1243, %v1648_v33   ;;  %559 = vperm.xlu2 %1246, %v1576_v21   ;;  %v1755_v3 = vpop.permute.xlu1 %164  ;;  %v1757_v38 = vpop.permute.xlu0 %159  ;;  %v1771_v21 = vld [vmem:[%s2125_s1] sm:$0x7] }
  0xae   :  { %v1774_v63 = vperm.slane %v1771_v21, 0  ;;  %v1777_v16 = vperm.slane %v1771_v21, 1 }
  0xb0   :  { %v235_v17 = vmul.f32 %v1774_v63, %v1691_v42 }
  0xb4   :  { %382 = vperm.xlu1 %1244, %v1625_v29   ;;  %v1760_v50 = vpop.permute.xlu2 %229 }
  0xb5   :  { %2147 = vst [vmem:[#allocation15_spill] sm:$0xff] %v1760_v50  ;;  %394 = vperm.xlu0 %1243, %v1643_v32   ;;  %v1763_v59 = vpop.permute.xlu1 %179  ;;  %487 = vperm.xlu2 %1246, %v1468_v2   ;;  %v1766_v62 = vpop.permute.xlu0 %174  ;;  %v2149_v50 = vmov 2  }
  0xb6   :  { %2148 = vst [vmem:[#allocation16_spill] sm:$0xff] %v1766_v62  ;;  %v2151_v62 = vmov 1  }
  0xbc   :  { %1247 = vset.pattern.permute.xlu1 %v2149_v50 }
  0xbd   :  { %1250 = vset.pattern.permute.xlu0 %v2149_v50  ;;  %v1781_v52 = vpop.permute.xlu1 %194  ;;  %523 = vperm.xlu1 %1247, %v1522_v12   ;;  %v1784_v2 = vpop.permute.xlu0 %189 }
  0xbe   :  { %2150 = vst [vmem:[#allocation17_spill] sm:$0xff] %v1781_v52  ;;  %563 = vperm.xlu2 %1246, %v1571_v20   ;;  %595 = vperm.xlu0 %1250, %v1630_v30   ;;  %v279_v25 = vpop.permute.xlu2 %278  ;;  %v237_v20 = vmul.f32 %v1774_v63, %v1671_v37 }
  0xbf   :  { %v416_v8 = vmul.f32 %v1777_v16, %v279_v25 }
  0xc1   :  { %v1791_v26 = vadd.f32 %v416_v8, %v235_v17 }
  0xc5   :  { %v1793_v56 = vpop.permute.xlu1 %209  ;;  %1248 = vset.pattern.permute.xlu1 %v2151_v62  ;;  %v1796_v52 = vpop.permute.xlu0 %204 }
  0xc6   :  { %491 = vperm.xlu2 %1246, %v1486_v6   ;;  %599 = vperm.xlu0 %1250, %v1625_v29   ;;  %v287_v12 = vpop.permute.xlu2 %286  ;;  %v240_v29 = vmul.f32 %v1774_v63, %v1709_v48  ;;  %v243_v48 = vmul.f32 %v1774_v63, %v1718_v51 }
  0xc7   :  { %v418_v30 = vmul.f32 %v1777_v16, %v287_v12  ;;  %386 = vperm.xlu1 %1248, %v1620_v28  }
  0xc9   :  { %v1804_v8 = vadd.f32 %v418_v30, %v237_v20 }
  0xcd   :  { %v1806_v17 = vpop.permute.xlu1 %224  ;;  %v1808_v25 = vpop.permute.xlu0 %219 }
  0xce   :  { %603 = vperm.xlu2 %1246, %v1620_v28   ;;  %527 = vperm.xlu0 %1250, %v1517_v11   ;;  %v299_v6 = vpop.permute.xlu2 %298  ;;  %v234_v11 = vmul.f32 %v1774_v63, %v1702_v46  ;;  %v861_v46 = vld [vmem:[%s2126_s2 + $0x70] sm:$0xff] }
  0xcf   :  { %v421_v37 = vmul.f32 %v1777_v16, %v299_v6  ;;  %1249 = vset.pattern.permute.xlu1 %v2149_v50 }
  0xd0   :  { %567 = vperm.xlu1 %1249, %v1566_v19  }
  0xd1   :  { %v1817_v42 = vadd.f32 %v421_v37, %v240_v29  ;;  %v246_v37 = vmul.f32 %v1774_v63, %v1727_v54 }
  0xd6   :  { %531 = vperm.xlu2 %1246, %v1512_v10   ;;  %575 = vperm.xlu0 %1250, %v1589_v23   ;;  %v311_v12 = vpop.permute.xlu2 %310  ;;  %v275_v28 = vpop.permute.xlu1 %274  ;;  %v862_v23 = vld [vmem:[%s2126_s2 + $0x78] sm:$0xff] }
  0xd7   :  { %v424_v20 = vmul.f32 %v1777_v16, %v311_v12  ;;  %v415_v30 = vmul.f32 %v1777_v16, %v275_v28  ;;  %v1827_v6 = vpop.permute.xlu0 %270  ;;  %1187 = vmatpush.msra.mxu2 %v862_v23  ;;  %863 = vmatpush.msra.mxu0 %v862_v23 }
  0xd8   :  { %495 = vperm.xlu1 %1249, %v1463_v1   ;;  %1186 = vmatpush.msra.mxu1 %v862_v23  ;;  %v236_v1 = vmul.f32 %v1774_v63, %v1700_v45 }
  0xd9   :  { %v1830_v19 = vadd.f32 %v424_v20, %v243_v48  ;;  %v1832_v10 = vadd.f32 %v415_v30, %v234_v11  ;;  %1188 = vmatpush.msra.mxu3 %v862_v23  ;;  %1190 = vmatpush.msra.mxu2 %v861_v46  ;;  %v860_v48 = vld [vmem:[%s2126_s2 + $0x68] sm:$0xff]  ;;  %v859_v20 = vld [vmem:[%s2126_s2 + $0x60] sm:$0xff]  ;;  %v239_v23 = vmul.f32 %v1774_v63, %v1711_v49 }
  0xda   :  { %864 = vmatpush.msra.mxu0 %v861_v46  ;;  %1189 = vmatpush.msra.mxu1 %v861_v46 }
  0xdb   :  { %1191 = vmatpush.msra.mxu3 %v861_v46  ;;  %1193 = vmatpush.msra.mxu2 %v860_v48 }
  0xdc   :  { %865 = vmatpush.msra.mxu0 %v860_v48  ;;  %1192 = vmatpush.msra.mxu1 %v860_v48 }
  0xdd   :  { %1196 = vmatpush.msra.mxu2 %v859_v20  ;;  %1194 = vmatpush.msra.mxu3 %v860_v48 }
  0xde   :  { %607 = vperm.xlu2 %1246, %v1648_v33   ;;  %579 = vperm.xlu0 %1250, %v1584_v22   ;;  %v323_v51 = vpop.permute.xlu2 %322  ;;  %v283_v29 = vpop.permute.xlu1 %282  ;;  %v238_v33 = vmul.f32 %v1774_v63, %v1678_v39  ;;  %v858_v39 = vld [vmem:[%s2126_s2 + $0x58] sm:$0xff] }
  0xdf   :  { %v427_v12 = vmul.f32 %v1777_v16, %v323_v51  ;;  %v417_v28 = vmul.f32 %v1777_v16, %v283_v29  ;;  %v291_v11 = vpop.permute.xlu0 %290  ;;  %866 = vmatpush.msra.mxu0 %v859_v20  ;;  %1195 = vmatpush.msra.mxu1 %v859_v20  ;;  %v249_v51 = vmul.f32 %v1774_v63, %v1736_v57 }
  0xe0   :  { %v419_v22 = vmul.f32 %v1777_v16, %v291_v11  ;;  %571 = vperm.xlu1 %1249, %v1594_v24   ;;  %1199 = vmatpush.msra.mxu2 %v858_v39  ;;  %v857_v24 = vld [vmem:[%s2126_s2 + $0x50] sm:$0xff]  ;;  %v855_v11 = vld [vmem:[%s2126_s2 + $0x40] sm:$0xff] }
  0xe1   :  { %v1855_v45 = vadd.f32 %v427_v12, %v246_v37  ;;  %v1857_v54 = vadd.f32 %v417_v28, %v236_v1  ;;  %1197 = vmatpush.msra.mxu3 %v859_v20  ;;  %867 = vmatpush.msra.mxu0 %v858_v39  ;;  %v856_v28 = vld [vmem:[%s2126_s2 + $0x48] sm:$0xff] }
  0xe2   :  { %v1862_v30 = vadd.f32 %v419_v22, %v238_v33  ;;  %1198 = vmatpush.msra.mxu1 %v858_v39  ;;  %1202 = vmatpush.msra.mxu2 %v857_v24 }
  0xe3   :  { %868 = vmatpush.msra.mxu0 %v857_v24  ;;  %1200 = vmatpush.msra.mxu3 %v858_v39  ;;  %v852_v39 = vld [vmem:[%s2126_s2 + $0x28] sm:$0xff] }
  0xe4   :  { %1205 = vmatpush.msra.mxu2 %v856_v28  ;;  %1201 = vmatpush.msra.mxu1 %v857_v24 }
  0xe5   :  { %869 = vmatpush.msra.mxu0 %v856_v28  ;;  %1203 = vmatpush.msra.mxu3 %v857_v24  ;;  %v244_v24 = vmul.f32 %v1774_v63, %v1688_v41  ;;  %v850_v41 = vld [vmem:[%s2126_s2 + $0x18] sm:$0xff] }
  0xe6   :  { %535 = vperm.xlu2 %1246, %v1540_v15   ;;  %507 = vperm.xlu0 %1250, %v1476_v4   ;;  %v335_v46 = vpop.permute.xlu2 %334  ;;  %v295_v1 = vpop.permute.xlu1 %294  ;;  %v241_v15 = vmul.f32 %v1774_v63, %v1683_v40  ;;  %v853_v40 = vld [vmem:[%s2126_s2 + $0x30] sm:$0xff] }
  0xe7   :  { %v430_v29 = vmul.f32 %v1777_v16, %v335_v46  ;;  %v420_v37 = vmul.f32 %v1777_v16, %v295_v1  ;;  %v303_v12 = vpop.permute.xlu0 %302  ;;  %1208 = vmatpush.msra.mxu2 %v855_v11  ;;  %870 = vmatpush.msra.mxu0 %v855_v11  ;;  %v851_v46 = vld [vmem:[%s2126_s2 + $0x20] sm:$0xff] }
  0xe8   :  { %v422_v4 = vmul.f32 %v1777_v16, %v303_v12  ;;  %499 = vperm.xlu1 %1249, %v1481_v5   ;;  %v854_v5 = vld [vmem:[%s2126_s2 + $0x38] sm:$0xff]  ;;  %1204 = vmatpush.msra.mxu1 %v856_v28  ;;  %v255_v12 = vmul.f32 %v1774_v63, %v1755_v3 }
  0xe9   :  { %v1885_v49 = vadd.f32 %v430_v29, %v249_v51  ;;  %v1887_v57 = vadd.f32 %v420_v37, %v239_v23  ;;  %1206 = vmatpush.msra.mxu3 %v856_v28  ;;  %1211 = vmatpush.msra.mxu2 %v854_v5  ;;  %v245_v51 = vmul.f32 %v1774_v63, %v1729_v55  ;;  %v848_v55 = vld [vmem:[%s2126_s2 + $0x8] sm:$0xff] }
  0xea   :  { %v1892_v48 = vadd.f32 %v422_v4, %v241_v15  ;;  %871 = vmatpush.msra.mxu0 %v854_v5  ;;  %1207 = vmatpush.msra.mxu1 %v855_v11 }
  0xeb   :  { %1214 = vmatpush.msra.mxu2 %v853_v40  ;;  %1209 = vmatpush.msra.mxu3 %v855_v11 }
  0xec   :  { %872 = vmatpush.msra.mxu0 %v853_v40  ;;  %1210 = vmatpush.msra.mxu1 %v854_v5 }
  0xed   :  { %1217 = vmatpush.msra.mxu2 %v852_v39  ;;  %1212 = vmatpush.msra.mxu3 %v854_v5 }
  0xee   :  { %1251 = vset.pattern.permute.xlu2 %v2151_v62  ;;  %619 = vperm.xlu0 %1250, %v1666_v36   ;;  %v1902_v33 = vpop.permute.xlu2 %346  ;;  %v1904_v22 = vpop.permute.xlu1 %306 }
  0xef   :  { %398 = vperm.xlu2 %1251, %v1638_v31   ;;  %v315_v20 = vpop.permute.xlu0 %314  ;;  %873 = vmatpush.msra.mxu0 %v852_v39 }
  0xf0   :  { %v425_v23 = vmul.f32 %v1777_v16, %v315_v20  ;;  %611 = vperm.xlu1 %1249, %v1643_v32   ;;  %1220 = vmatpush.msra.mxu2 %v851_v46  ;;  %v849_v32 = vld [vmem:[%s2126_s2 + $0x10] sm:$0xff]  ;;  %v847_v20 = vld [vmem:[%s2126_s2] sm:$0xff]  ;;  %s1432_s2 = smov [#allocation2]  }
  0xf1   :  { %874 = vmatpush.msra.mxu0 %v851_v46  ;;  %1213 = vmatpush.msra.mxu1 %v853_v40  ;;  %s1172_s6 = sshll.u32 %s1432_s2, 4  ;;  %s1173_s6 = int_to_ptr.vmem [resolvable:$true] %s1172_s6 }
  0xf2   :  { %v1917_v1 = vadd.f32 %v425_v23, %v244_v24  ;;  %1223 = vmatpush.msra.mxu2 %v850_v41  ;;  %1215 = vmatpush.msra.mxu3 %v853_v40  ;;  %v258_v23 = vmul.f32 %v1774_v63, %v1763_v59 }
  0xf3   :  { %875 = vmatpush.msra.mxu0 %v850_v41  ;;  %1216 = vmatpush.msra.mxu1 %v852_v39 }
  0xf4   :  { %1226 = vmatpush.msra.mxu2 %v849_v32  ;;  %1218 = vmatpush.msra.mxu3 %v852_v39 }
  0xf5   :  { %876 = vmatpush.msra.mxu0 %v849_v32  ;;  %1219 = vmatpush.msra.mxu1 %v851_v46 }
  0xf6   :  { %547 = vperm.xlu0 %1250, %v1558_v18   ;;  %v359_v29 = vpop.permute.xlu2 %358  ;;  %v319_v37 = vpop.permute.xlu1 %318  ;;  %v247_v18 = vmul.f32 %v1774_v63, %v1697_v44  ;;  %1229 = vmatpush.msra.mxu2 %v848_v55 }
  0xf7   :  { %v436_v28 = vmul.f32 %v1777_v16, %v359_v29  ;;  %v426_v15 = vmul.f32 %v1777_v16, %v319_v37  ;;  %1252 = vset.pattern.permute.xlu2 %v2149_v50  ;;  %v327_v4 = vpop.permute.xlu0 %326  ;;  %877 = vmatpush.msra.mxu0 %v848_v55  ;;  %v250_v29 = vmul.f32 %v1774_v63, %v1706_v47 }
  0xf8   :  { %v428_v11 = vmul.f32 %v1777_v16, %v327_v4  ;;  %503 = vperm.xlu1 %1249, %v1458_v0   ;;  %539 = vperm.xlu2 %1252, %v1535_v14   ;;  %v248_v0 = vmul.f32 %v1774_v63, %v1738_v58 }
  0xf9   :  { %v1941_v3 = vadd.f32 %v436_v28, %v255_v12  ;;  %v1943_v5 = vadd.f32 %v426_v15, %v245_v51  ;;  %1232 = vmatpush.msra.mxu2 %v847_v20  ;;  %878 = vmatpush.msra.mxu0 %v847_v20  ;;  %v1971_v12 = vperm.slane %v1771_v21, 2  ;;  %v414_v15 = vmul.f32 %v1777_v16, %v1827_v6 }
  0xfa   :  { %v1948_v24 = vadd.f32 %v428_v11, %v247_v18  ;;  %1221 = vmatpush.msra.mxu3 %v851_v46  ;;  %1222 = vmatpush.msra.mxu1 %v850_v41  ;;  %v254_v11 = vmul.f32 %v1774_v63, %v1757_v38 }
  0xfc   :  { %1224 = vmatpush.msra.mxu3 %v850_v41  ;;  %1225 = vmatpush.msra.mxu1 %v849_v32 }
  0xfe   :  { %1257 = vset.pattern.permute.xlu0 %v2151_v62  ;;  %v371_v14 = vpop.permute.xlu2 %370  ;;  %v331_v44 = vpop.permute.xlu1 %330  ;;  %1227 = vmatpush.msra.mxu3 %v849_v32 }
  0xff   :  { %v439_v51 = vmul.f32 %v1777_v16, %v371_v14  ;;  %v429_v40 = vmul.f32 %v1777_v16, %v331_v44  ;;  %410 = vperm.xlu0 %1257, %v1656_v34   ;;  %v339_v39 = vpop.permute.xlu0 %338  ;;  %1228 = vmatpush.msra.mxu1 %v848_v55 }
 0x100   :  { %v431_v58 = vmul.f32 %v1777_v16, %v339_v39  ;;  %615 = vperm.xlu1 %1249, %v1638_v31   ;;  %1253 = vset.pattern.permute.xlu2 %v2151_v62  ;;  %v251_v31 = vmul.f32 %v1774_v63, %v1747_v61 }
 0x101   :  { %v1963_v46 = vadd.f32 %v439_v51, %v258_v23  ;;  %v1965_v59 = vadd.f32 %v429_v40, %v248_v0  ;;  %402 = vperm.xlu2 %1253, %v1666_v36   ;;  %1230 = vmatpush.msra.mxu3 %v848_v55  ;;  %v233_v55 = vmul.f32 %v1774_v63, %v1693_v43 }
 0x102   :  { %v1968_v37 = vadd.f32 %v431_v58, %v250_v29  ;;  %1231 = vmatpush.msra.mxu1 %v847_v20  ;;  %v2152_v29 = vld [vmem:[#allocation16_spill] sm:$0xff] }
 0x103   :  { %1233 = vmatpush.msra.mxu3 %v847_v20  ;;  %v450_v0 = vadd.f32 %v414_v15, %v233_v55  ;;  %v257_v58 = vmul.f32 %v1774_v63, %v2152_v29  ;;  %v2157_v29 = vld [vmem:[#allocation8_spill] sm:$0xff] }
 0x106   :  { %v343_v47 = vpop.permute.xlu1 %342 }
 0x107   :  { %v432_v28 = vmul.f32 %v1777_v16, %v343_v47  ;;  %1258 = vset.pattern.permute.xlu0 %v2149_v50  ;;  %v1977_v36 = vpop.permute.xlu0 %350  ;;  %v560_v41 = vpop.permute.xlu2 %559 }
 0x108   :  { %v649_v32 = vmul.f32 %v1971_v12, %v560_v41  ;;  %543 = vperm.xlu1 %1249, %v1530_v13   ;;  %519 = vperm.xlu0 %1258, %v1494_v7  }
 0x109   :  { %v468_v21 = vadd.f32 %v432_v28, %v251_v31  ;;  %1254 = vset.pattern.permute.xlu2 %v2149_v50  ;;  %v2153_v28 = vld [vmem:[#allocation12_spill] sm:$0xff] }
 0x10a   :  { %583 = vperm.xlu2 %1254, %v1612_v27   ;;  %v256_v27 = vmul.f32 %v1774_v63, %v1724_v53  ;;  %v433_v53 = vmul.f32 %v1777_v16, %v1902_v33 }
 0x10b   :  { %v685_v61 = vadd.f32 %v649_v32, %v468_v21 }
 0x10d   :  { %v721_v4 = vmul.f32 0.5, %v685_v61 }
 0x10e   :  { %v355_v18 = vpop.permute.xlu1 %354 }
 0x10f   :  { %1259 = vtanh.f32 %v721_v4  ;;  %v435_v7 = vmul.f32 %v1777_v16, %v355_v18  ;;  %v363_v13 = vpop.permute.xlu0 %362  ;;  %v488_v20 = vpop.permute.xlu2 %487  ;;  %v2154_v4 = vld [vmem:[#allocation9_spill] sm:$0xff] }
 0x110   :  { %v437_v14 = vmul.f32 %v1777_v16, %v363_v13  ;;  %1255 = vset.pattern.permute.xlu1 %v2151_v62  ;;  %v631_v6 = vmul.f32 %v1971_v12, %v488_v20  ;;  %v252_v62 = vmul.f32 %v1774_v63, %v1745_v60 }
 0x111   :  { %v1996_v43 = vadd.f32 %v435_v7, %v254_v11  ;;  %406 = vperm.xlu1 %1255, %v1661_v35  }
 0x112   :  { %v1999_v38 = vadd.f32 %v437_v14, %v256_v27  ;;  %v667_v44 = vadd.f32 %v631_v6, %v450_v0  ;;  %511 = vperm.xlu2 %1254, %v1504_v9   ;;  %v259_v9 = vmul.f32 %v1774_v63, %v2153_v28  ;;  %v469_v33 = vadd.f32 %v433_v53, %v252_v62  ;;  %v2156_v6 = vld [vmem:[#allocation7_spill] sm:$0xff] }
 0x114   :  { %v703_v23 = vmul.f32 0.5, %v667_v44 }
 0x115   :  { %v1260_v51 = vpop.eup %1259 }
 0x116   :  { %1261 = vtanh.f32 %v703_v23  ;;  %v367_v40 = vpop.permute.xlu1 %366  ;;  %v793_v39 = vmul.f32 0.5, %v1260_v51 }
 0x117   :  { %v438_v47 = vmul.f32 %v1777_v16, %v367_v40  ;;  %v375_v31 = vpop.permute.xlu0 %374 }
 0x118   :  { %v440_v41 = vmul.f32 %v1777_v16, %v375_v31  ;;  %v564_v32 = vpop.permute.xlu2 %563  ;;  %v829_v21 = vadd.f32 0.5, %v793_v39  ;;  %v2158_v31 = vld [vmem:[#allocation11_spill] sm:$0xff] }
 0x119   :  { %v2012_v61 = vadd.f32 %v438_v47, %v257_v58  ;;  %v650_v15 = vmul.f32 %v1971_v12, %v564_v32  ;;  %1256 = vset.pattern.permute.xlu1 %v2149_v50  ;;  %v2155_v50 = vld [vmem:[#allocation5_spill] sm:$0xff]  ;;  %v423_v58 = vmul.f32 %v1777_v16, %v1904_v22  ;;  %v242_v28 = vmul.f32 %v1774_v63, %v2158_v31 }
 0x11a   :  { %v2016_v60 = vadd.f32 %v440_v41, %v259_v9  ;;  %587 = vperm.xlu1 %1256, %v2154_v4   ;;  %623 = vperm.xlu2 %1254, %v1661_v35   ;;  %v260_v41 = vmul.f32 %v1774_v63, %v1784_v2  ;;  %v2160_v2 = vld [vmem:[#allocation17_spill] sm:$0xff] }
 0x11b   :  { %v686_v55 = vadd.f32 %v650_v15, %v469_v33  ;;  %933 = vmatmul.f32.vlgmr.msra.gmra.mxu2 %v829_v21  ;;  %v459_v21 = vadd.f32 %v423_v58, %v242_v28 }
 0x11c   :  { %v1262_v18 = vpop.eup %1261 }
 0x11d   :  { %v722_v11 = vmul.f32 0.5, %v686_v55  ;;  %v775_v7 = vmul.f32 0.5, %v1262_v18 }
 0x11e   :  { %v379_v13 = vpop.permute.xlu1 %378 }
 0x11f   :  { %1263 = vtanh.f32 %v722_v11  ;;  %v391_v20 = vpop.permute.xlu0 %390  ;;  %v811_v27 = vadd.f32 0.5, %v775_v7  ;;  %v2159_v11 = vld [vmem:[#allocation6_spill] sm:$0xff] }
 0x120   :  { %v492_v0 = vpop.permute.xlu2 %491 }
 0x121   :  { %v632_v14 = vmul.f32 %v1971_v12, %v492_v0  ;;  %879 = vmatmul.f32.vlgmr.msra.gmra.mxu0 %v811_v27 }
 0x122   :  { %515 = vperm.xlu1 %1256, %v2155_v50   ;;  %551 = vperm.xlu2 %1254, %v2156_v6  }
 0x123   :  { %v668_v44 = vadd.f32 %v632_v14, %v1832_v10  ;;  %v441_v10 = vmul.f32 %v1777_v16, %v379_v13  ;;  %v261_v14 = vmul.f32 %v1774_v63, %v2160_v2 }
 0x125   :  { %v1264_v35 = vpop.eup %1263  ;;  %v704_v23 = vmul.f32 0.5, %v668_v44  ;;  %v477_v55 = vadd.f32 %v441_v10, %v260_v41  ;;  %v444_v41 = vmul.f32 %v1777_v16, %v391_v20 }
 0x126   :  { %v383_v51 = vpop.permute.xlu1 %382  ;;  %v794_v53 = vmul.f32 0.5, %v1264_v35 }
 0x127   :  { %1265 = vtanh.f32 %v704_v23  ;;  %v2024_v40 = vpop.permute.xlu0 %394  ;;  %v442_v27 = vmul.f32 %v1777_v16, %v383_v51 }
 0x128   :  { %v604_v39 = vpop.permute.xlu2 %603  ;;  %v830_v62 = vadd.f32 0.5, %v794_v53  ;;  %v2161_v53 = vld [vmem:[#allocation13_spill] sm:$0xff] }
 0x129   :  { %v478_v44 = vadd.f32 %v442_v27, %v261_v14  ;;  %v660_v51 = vmul.f32 %v1971_v12, %v604_v39 }
 0x12a   :  { %591 = vperm.xlu1 %1256, %v2157_v29   ;;  %627 = vperm.xlu2 %1254, %v1656_v34  }
 0x12b   :  { %936 = vmatmul.f32.gmra.mxu2 %v830_v62  ;;  %v262_v62 = vmul.f32 %v1774_v63, %v2161_v53 }
 0x12d   :  { %v1266_v47 = vpop.eup %1265 }
 0x12e   :  { %v776_v9 = vmul.f32 0.5, %v1266_v47 }
 0x12f   :  { %v524_v32 = vpop.permute.xlu1 %523 }
 0x130   :  { %v640_v33 = vmul.f32 %v1971_v12, %v524_v32  ;;  %v532_v15 = vpop.permute.xlu2 %531  ;;  %v596_v34 = vpop.permute.xlu0 %595  ;;  %v812_v4 = vadd.f32 0.5, %v776_v9 }
 0x131   :  { %v658_v22 = vmul.f32 %v1971_v12, %v596_v34 }
 0x132   :  { %v676_v18 = vadd.f32 %v640_v33, %v459_v21  ;;  %555 = vperm.xlu1 %1256, %v2159_v11   ;;  %882 = vmatmul.f32.gmra.mxu0 %v812_v4  ;;  %v434_v21 = vmul.f32 %v1777_v16, %v1977_v36  ;;  %v642_v33 = vmul.f32 %v1971_v12, %v532_v15 }
 0x133   :  { %v694_v7 = vadd.f32 %v658_v22, %v477_v55  ;;  %v263_v55 = vmul.f32 %v1774_v63, %v1796_v52 }
 0x134   :  { %v712_v13 = vmul.f32 0.5, %v676_v18  ;;  %v678_v2 = vadd.f32 %v642_v33, %v1917_v1 }
 0x135   :  { %v730_v0 = vmul.f32 0.5, %v694_v7  ;;  %v2162_v7 = vld [vmem:[#allocation10_spill] sm:$0xff]  ;;  %v480_v27 = vadd.f32 %v444_v41, %v263_v55 }
 0x136   :  { %1267 = vtanh.f32 %v712_v13  ;;  %v253_v20 = vmul.f32 %v1774_v63, %v2162_v7 }
 0x137   :  { %1269 = vtanh.f32 %v730_v0 }
 0x138   :  { %v608_v50 = vpop.permute.xlu2 %607  ;;  %v600_v6 = vpop.permute.xlu0 %599  ;;  %v470_v0 = vadd.f32 %v434_v21, %v253_v20 }
 0x139   :  { %v659_v35 = vmul.f32 %v1971_v12, %v600_v6  ;;  %v387_v23 = vpop.permute.xlu1 %386  ;;  %v661_v22 = vmul.f32 %v1971_v12, %v608_v50 }
 0x13a   :  { %v443_v29 = vmul.f32 %v1777_v16, %v387_v23  ;;  %v714_v23 = vmul.f32 0.5, %v678_v2 }
 0x13b   :  { %v695_v58 = vadd.f32 %v659_v35, %v478_v44  ;;  %v697_v50 = vadd.f32 %v661_v22, %v480_v27 }
 0x13c   :  { %v1268_v47 = vpop.eup %1267  ;;  %v479_v10 = vadd.f32 %v443_v29, %v262_v62 }
 0x13d   :  { %v731_v31 = vmul.f32 0.5, %v695_v58  ;;  %v784_v28 = vmul.f32 0.5, %v1268_v47  ;;  %v1270_v9 = vpop.eup %1269  ;;  %v733_v29 = vmul.f32 0.5, %v697_v50 }
 0x13e   :  { %v696_v32 = vadd.f32 %v660_v51, %v479_v10  ;;  %v802_v4 = vmul.f32 0.5, %v1270_v9 }
 0x13f   :  { %v820_v34 = vadd.f32 0.5, %v784_v28  ;;  %1271 = vtanh.f32 %v731_v31 }
 0x140   :  { %v536_v39 = vpop.permute.xlu2 %535  ;;  %v528_v18 = vpop.permute.xlu0 %527  ;;  %v732_v11 = vmul.f32 0.5, %v696_v32  ;;  %v838_v36 = vadd.f32 0.5, %v802_v4 }
 0x141   :  { %v641_v13 = vmul.f32 %v1971_v12, %v528_v18  ;;  %906 = vmatmul.f32.vlgmr.msra.gmra.mxu1 %v820_v34  ;;  %v643_v58 = vmul.f32 %v1971_v12, %v536_v39 }
 0x142   :  { %v568_v15 = vpop.permute.xlu1 %567  ;;  %960 = vmatmul.f32.vlgmr.msra.gmra.mxu3 %v838_v36  ;;  %1273 = vtanh.f32 %v732_v11 }
 0x143   :  { %v677_v52 = vadd.f32 %v641_v13, %v1830_v19  ;;  %v651_v14 = vmul.f32 %v1971_v12, %v568_v15  ;;  %v679_v31 = vadd.f32 %v643_v58, %v1943_v5 }
 0x145   :  { %v713_v6 = vmul.f32 0.5, %v677_v52  ;;  %v687_v44 = vadd.f32 %v651_v14, %v470_v0  ;;  %v1272_v35 = vpop.eup %1271  ;;  %v715_v4 = vmul.f32 0.5, %v679_v31 }
 0x146   :  { %v803_v62 = vmul.f32 0.5, %v1272_v35 }
 0x147   :  { %v723_v53 = vmul.f32 0.5, %v687_v44  ;;  %1275 = vtanh.f32 %v713_v6 }
 0x148   :  { %v839_v1 = vadd.f32 0.5, %v803_v62  ;;  %v1274_v19 = vpop.eup %1273  ;;  %v576_v28 = vpop.permute.xlu0 %575 }
 0x149   :  { %1277 = vtanh.f32 %v723_v53  ;;  %v2060_v47 = vpop.permute.xlu2 %398  ;;  %v804_v41 = vmul.f32 0.5, %v1274_v19  ;;  %v653_v39 = vmul.f32 %v1971_v12, %v576_v28  ;;  %v445_v28 = vmul.f32 %v1777_v16, %v2024_v40 }
 0x14a   :  { %v496_v51 = vpop.permute.xlu1 %495  ;;  %1279 = vtanh.f32 %v714_v23  ;;  %963 = vmatmul.f32.gmra.mxu3 %v839_v1 }
 0x14b   :  { %v633_v10 = vmul.f32 %v1971_v12, %v496_v51  ;;  %1281 = vtanh.f32 %v733_v29  ;;  %v840_v11 = vadd.f32 0.5, %v804_v41  ;;  %v689_v15 = vadd.f32 %v653_v39, %v1941_v3 }
 0x14d   :  { %v669_v9 = vadd.f32 %v633_v10, %v1791_v26  ;;  %v1276_v32 = vpop.eup %1275  ;;  %v725_v53 = vmul.f32 0.5, %v689_v15 }
 0x14e   :  { %v785_v34 = vmul.f32 0.5, %v1276_v32  ;;  %v264_v32 = vmul.f32 %v1774_v63, %v1793_v56 }
 0x14f   :  { %v1278_v21 = vpop.eup %1277  ;;  %v705_v33 = vmul.f32 0.5, %v669_v9 }
 0x150   :  { %v795_v55 = vmul.f32 0.5, %v1278_v21  ;;  %v1280_v22 = vpop.eup %1279  ;;  %v821_v18 = vadd.f32 0.5, %v785_v34  ;;  %v580_v14 = vpop.permute.xlu0 %579  ;;  %v481_v39 = vadd.f32 %v445_v28, %v264_v32 }
 0x151   :  { %1283 = vtanh.f32 %v705_v33  ;;  %v1282_v7 = vpop.eup %1281  ;;  %v786_v27 = vmul.f32 0.5, %v1280_v22  ;;  %v654_v62 = vmul.f32 %v1971_v12, %v580_v14 }
 0x152   :  { %v572_v20 = vpop.permute.xlu1 %571  ;;  %v540_v13 = vpop.permute.xlu2 %539  ;;  %v831_v5 = vadd.f32 0.5, %v795_v55  ;;  %909 = vmatmul.f32.gmra.mxu1 %v821_v18  ;;  %966 = vmatmul.f32.gmra.mxu3 %v840_v11  ;;  %1285 = vtanh.f32 %v715_v4  ;;  %v805_v52 = vmul.f32 0.5, %v1282_v7 }
 0x153   :  { %v652_v36 = vmul.f32 %v1971_v12, %v572_v20  ;;  %v644_v26 = vmul.f32 %v1971_v12, %v540_v13  ;;  %v822_v35 = vadd.f32 0.5, %v786_v27 }
 0x154   :  { %939 = vmatmul.f32.gmra.mxu2 %v831_v5  ;;  %v841_v29 = vadd.f32 0.5, %v805_v52 }
 0x155   :  { %v688_v0 = vadd.f32 %v652_v36, %v1996_v43  ;;  %v680_v2 = vadd.f32 %v644_v26, %v1855_v45  ;;  %v690_v43 = vadd.f32 %v654_v62, %v1999_v38  ;;  %v446_v62 = vmul.f32 %v1777_v16, %v2060_v47 }
 0x157   :  { %v1284_v50 = vpop.eup %1283  ;;  %v724_v6 = vmul.f32 0.5, %v688_v0  ;;  %v716_v44 = vmul.f32 0.5, %v680_v2  ;;  %v726_v21 = vmul.f32 0.5, %v690_v43 }
 0x158   :  { %v777_v23 = vmul.f32 0.5, %v1284_v50  ;;  %v1286_v58 = vpop.eup %1285  ;;  %v508_v33 = vpop.permute.xlu0 %507 }
 0x159   :  { %1287 = vtanh.f32 %v724_v6  ;;  %v787_v10 = vmul.f32 0.5, %v1286_v58  ;;  %v636_v26 = vmul.f32 %v1971_v12, %v508_v33 }
 0x15a   :  { %v500_v1 = vpop.permute.xlu1 %499  ;;  %v813_v19 = vadd.f32 0.5, %v777_v23  ;;  %912 = vmatmul.f32.gmra.mxu1 %v822_v35  ;;  %969 = vmatmul.f32.gmra.mxu3 %v841_v29  ;;  %1289 = vtanh.f32 %v716_v44 }
 0x15b   :  { %v634_v3 = vmul.f32 %v1971_v12, %v500_v1  ;;  %v403_v45 = vpop.permute.xlu2 %402  ;;  %1291 = vtanh.f32 %v725_v53  ;;  %v823_v34 = vadd.f32 0.5, %v787_v10  ;;  %v672_v35 = vadd.f32 %v636_v26, %v1862_v30 }
 0x15c   :  { %885 = vmatmul.f32.gmra.mxu0 %v813_v19  ;;  %v447_v58 = vmul.f32 %v1777_v16, %v403_v45  ;;  %v2163_v19 = vld [vmem:[#allocation14_spill] sm:$0xff]  ;;  %v266_v30 = vmul.f32 %v1774_v63, %v1808_v25 }
 0x15d   :  { %v670_v51 = vadd.f32 %v634_v3, %v1857_v54  ;;  %v265_v3 = vmul.f32 %v1774_v63, %v2163_v19  ;;  %v708_v43 = vmul.f32 0.5, %v672_v35 }
 0x15f   :  { %v1288_v31 = vpop.eup %1287  ;;  %v706_v9 = vmul.f32 0.5, %v670_v51 }
 0x160   :  { %v796_v41 = vmul.f32 0.5, %v1288_v31  ;;  %v1290_v4 = vpop.eup %1289  ;;  %v620_v50 = vpop.permute.xlu0 %619 }
 0x161   :  { %1293 = vtanh.f32 %v706_v9  ;;  %v1292_v38 = vpop.eup %1291  ;;  %v788_v7 = vmul.f32 0.5, %v1290_v4  ;;  %v482_v9 = vadd.f32 %v446_v62, %v265_v3 }
 0x162   :  { %v612_v55 = vpop.permute.xlu1 %611  ;;  %v832_v22 = vadd.f32 0.5, %v796_v41  ;;  %915 = vmatmul.f32.gmra.mxu1 %v823_v34  ;;  %1295 = vtanh.f32 %v726_v21  ;;  %v797_v56 = vmul.f32 0.5, %v1292_v38  ;;  %v483_v41 = vadd.f32 %v447_v58, %v266_v30 }
 0x163   :  { %v662_v54 = vmul.f32 %v1971_v12, %v612_v55  ;;  %v824_v15 = vadd.f32 0.5, %v788_v7 }
 0x164   :  { %v584_v18 = vpop.permute.xlu2 %583  ;;  %942 = vmatmul.f32.gmra.mxu2 %v832_v22  ;;  %v833_v52 = vadd.f32 0.5, %v797_v56 }
 0x165   :  { %v698_v40 = vadd.f32 %v662_v54, %v481_v39  ;;  %v655_v11 = vmul.f32 %v1971_v12, %v584_v18 }
 0x167   :  { %v1294_v20 = vpop.eup %1293  ;;  %v734_v13 = vmul.f32 0.5, %v698_v40  ;;  %v691_v5 = vadd.f32 %v655_v11, %v2012_v61 }
 0x168   :  { %v778_v36 = vmul.f32 0.5, %v1294_v20  ;;  %v1296_v14 = vpop.eup %1295  ;;  %v548_v21 = vpop.permute.xlu0 %547 }
 0x169   :  { %1297 = vtanh.f32 %v734_v13  ;;  %v727_v27 = vmul.f32 0.5, %v691_v5  ;;  %v798_v23 = vmul.f32 0.5, %v1296_v14  ;;  %v646_v39 = vmul.f32 %v1971_v12, %v548_v21 }
 0x16a   :  { %v504_v0 = vpop.permute.xlu1 %503  ;;  %v814_v2 = vadd.f32 0.5, %v778_v36  ;;  %918 = vmatmul.f32.gmra.mxu1 %v824_v15 }
 0x16b   :  { %v635_v6 = vmul.f32 %v1971_v12, %v504_v0  ;;  %1299 = vtanh.f32 %v727_v27  ;;  %v834_v31 = vadd.f32 0.5, %v798_v23  ;;  %v267_v23 = vmul.f32 %v1774_v63, %v1806_v17 }
 0x16c   :  { %v512_v44 = vpop.permute.xlu2 %511  ;;  %888 = vmatmul.f32.gmra.mxu0 %v814_v2  ;;  %945 = vmatmul.f32.gmra.mxu2 %v833_v52 }
 0x16d   :  { %v671_v61 = vadd.f32 %v635_v6, %v1804_v8  ;;  %v637_v51 = vmul.f32 %v1971_v12, %v512_v44  ;;  %v664_v8 = vmul.f32 %v1971_v12, %v620_v50 }
 0x16f   :  { %v1298_v53 = vpop.eup %1297  ;;  %v707_v29 = vmul.f32 0.5, %v671_v61  ;;  %v673_v33 = vadd.f32 %v637_v51, %v1887_v57  ;;  %v700_v4 = vadd.f32 %v664_v8, %v483_v41  ;;  %v682_v57 = vadd.f32 %v646_v39, %v1965_v59  ;;  %v2164_v61 = vld [vmem:[#allocation15_spill] sm:$0xff] }
 0x170   :  { %v806_v1 = vmul.f32 0.5, %v1298_v53 }
 0x171   :  { %1301 = vtanh.f32 %v707_v29  ;;  %v1300_v47 = vpop.eup %1299  ;;  %v709_v54 = vmul.f32 0.5, %v673_v33  ;;  %v736_v18 = vmul.f32 0.5, %v700_v4  ;;  %v411_v27 = vpop.permute.xlu0 %410  ;;  %v718_v2 = vmul.f32 0.5, %v682_v57 }
 0x172   :  { %v616_v10 = vpop.permute.xlu1 %615  ;;  %v842_v28 = vadd.f32 0.5, %v806_v1  ;;  %1303 = vtanh.f32 %v708_v43  ;;  %v799_v25 = vmul.f32 0.5, %v1300_v47  ;;  %v449_v14 = vmul.f32 %v1777_v16, %v411_v27 }
 0x173   :  { %v663_v45 = vmul.f32 %v1971_v12, %v616_v10 }
 0x174   :  { %v624_v32 = vpop.permute.xlu2 %623  ;;  %948 = vmatmul.f32.gmra.mxu2 %v834_v31  ;;  %972 = vmatmul.f32.gmra.mxu3 %v842_v28  ;;  %v835_v7 = vadd.f32 0.5, %v799_v25 }
 0x175   :  { %v699_v34 = vadd.f32 %v663_v45, %v482_v9  ;;  %v665_v19 = vmul.f32 %v1971_v12, %v624_v32 }
 0x177   :  { %v1302_v55 = vpop.eup %1301  ;;  %v735_v22 = vmul.f32 0.5, %v699_v34 }
 0x178   :  { %v779_v38 = vmul.f32 0.5, %v1302_v55  ;;  %v1304_v56 = vpop.eup %1303 }
 0x179   :  { %1305 = vtanh.f32 %v735_v22  ;;  %v780_v36 = vmul.f32 0.5, %v1304_v56 }
 0x17a   :  { %v544_v40 = vpop.permute.xlu1 %543  ;;  %v815_v11 = vadd.f32 0.5, %v779_v38  ;;  %1307 = vtanh.f32 %v709_v54  ;;  %v520_v33 = vpop.permute.xlu0 %519 }
 0x17b   :  { %v645_v20 = vmul.f32 %v1971_v12, %v544_v40  ;;  %1309 = vtanh.f32 %v736_v18  ;;  %v816_v50 = vadd.f32 0.5, %v780_v36  ;;  %v639_v22 = vmul.f32 %v1971_v12, %v520_v33 }
 0x17c   :  { %v552_v13 = vpop.permute.xlu2 %551  ;;  %891 = vmatmul.f32.gmra.mxu0 %v815_v11  ;;  %951 = vmatmul.f32.gmra.mxu2 %v835_v7 }
 0x17d   :  { %v681_v5 = vadd.f32 %v645_v20, %v1948_v24  ;;  %v647_v52 = vmul.f32 %v1971_v12, %v552_v13  ;;  %v268_v24 = vmul.f32 %v1774_v63, %v2164_v61  ;;  %v675_v7 = vadd.f32 %v639_v22, %v1892_v48 }
 0x17f   :  { %v1306_v26 = vpop.eup %1305  ;;  %v717_v15 = vmul.f32 0.5, %v681_v5  ;;  %v683_v29 = vadd.f32 %v647_v52, %v1885_v49  ;;  %v485_v1 = vadd.f32 %v449_v14, %v268_v24  ;;  %v711_v36 = vmul.f32 0.5, %v675_v7 }
 0x180   :  { %v807_v0 = vmul.f32 0.5, %v1306_v26  ;;  %v1308_v44 = vpop.eup %1307 }
 0x181   :  { %1311 = vtanh.f32 %v717_v15  ;;  %v1310_v59 = vpop.eup %1309  ;;  %v781_v43 = vmul.f32 0.5, %v1308_v44  ;;  %v719_v17 = vmul.f32 0.5, %v683_v29 }
 0x182   :  { %v843_v6 = vadd.f32 0.5, %v807_v0  ;;  %1313 = vtanh.f32 %v718_v2  ;;  %v808_v30 = vmul.f32 0.5, %v1310_v59 }
 0x183   :  { %v407_v35 = vpop.permute.xlu1 %406 }
 0x184   :  { %v448_v53 = vmul.f32 %v1777_v16, %v407_v35  ;;  %v628_v62 = vpop.permute.xlu2 %627  ;;  %894 = vmatmul.f32.gmra.mxu0 %v816_v50  ;;  %975 = vmatmul.f32.gmra.mxu3 %v843_v6  ;;  %v817_v16 = vadd.f32 0.5, %v781_v43  ;;  %v844_v9 = vadd.f32 0.5, %v808_v30 }
 0x185   :  { %v666_v58 = vmul.f32 %v1971_v12, %v628_v62 }
 0x186   :  { %v484_v3 = vadd.f32 %v448_v53, %v267_v23 }
 0x187   :  { %v1312_v51 = vpop.eup %1311  ;;  %v702_v10 = vadd.f32 %v666_v58, %v485_v1 }
 0x188   :  { %v701_v8 = vadd.f32 %v665_v19, %v484_v3  ;;  %v789_v63 = vmul.f32 0.5, %v1312_v51  ;;  %v1314_v47 = vpop.eup %1313 }
 0x189   :  { %v738_v45 = vmul.f32 0.5, %v702_v10  ;;  %v790_v32 = vmul.f32 0.5, %v1314_v47 }
 0x18a   :  { %v825_v31 = vadd.f32 0.5, %v789_v63  ;;  %v737_v28 = vmul.f32 0.5, %v701_v8 }
 0x18b   :  { %v826_v25 = vadd.f32 0.5, %v790_v32 }
 0x18c   :  { %v588_v49 = vpop.permute.xlu1 %587  ;;  %897 = vmatmul.f32.gmra.mxu0 %v817_v16  ;;  %921 = vmatmul.f32.gmra.mxu1 %v825_v31  ;;  %1315 = vtanh.f32 %v737_v28 }
 0x18d   :  { %1317 = vtanh.f32 %v719_v17  ;;  %v656_v41 = vmul.f32 %v1971_v12, %v588_v49  ;;  %978 = vmatmul.f32.gmra.mxu3 %v844_v9 }
 0x18e   :  { %1319 = vtanh.f32 %v738_v45 }
 0x18f   :  { %v692_v21 = vadd.f32 %v656_v41, %v1963_v46 }
 0x191   :  { %v728_v34 = vmul.f32 0.5, %v692_v21 }
 0x192   :  { %v1316_v4 = vpop.eup %1315 }
 0x193   :  { %v1318_v55 = vpop.eup %1317  ;;  %1321 = vtanh.f32 %v728_v34  ;;  %v809_v38 = vmul.f32 0.5, %v1316_v4 }
 0x194   :  { %v516_v39 = vpop.permute.xlu1 %515  ;;  %924 = vmatmul.f32.gmra.mxu1 %v826_v25  ;;  %v1320_v40 = vpop.eup %1319  ;;  %v791_v11 = vmul.f32 0.5, %v1318_v55 }
 0x195   :  { %v638_v54 = vmul.f32 %v1971_v12, %v516_v39  ;;  %v845_v18 = vadd.f32 0.5, %v809_v38  ;;  %v810_v13 = vmul.f32 0.5, %v1320_v40 }
 0x196   :  { %v827_v57 = vadd.f32 0.5, %v791_v11 }
 0x197   :  { %v674_v46 = vadd.f32 %v638_v54, %v1817_v42  ;;  %981 = vmatmul.f32.gmra.mxu3 %v845_v18  ;;  %v846_v0 = vadd.f32 0.5, %v810_v13 }
 0x199   :  { %v1322_v56 = vpop.eup %1321  ;;  %v710_v20 = vmul.f32 0.5, %v674_v46 }
 0x19a   :  { %v800_v5 = vmul.f32 0.5, %v1322_v56 }
 0x19b   :  { %1323 = vtanh.f32 %v710_v20 }
 0x19c   :  { %v592_v26 = vpop.permute.xlu1 %591  ;;  %927 = vmatmul.f32.gmra.mxu1 %v827_v57  ;;  %v836_v27 = vadd.f32 0.5, %v800_v5  ;;  %1325 = vtanh.f32 %v711_v36 }
 0x19d   :  { %v657_v15 = vmul.f32 %v1971_v12, %v592_v26 }
 0x19e   :  { %v934_v2 = vpop.f32.mrf.mxu2  ;;  %954 = vmatmul.f32.gmra.mxu2 %v836_v27  ;;  %v880_v52 = vpop.f32.mrf.mxu0 }
 0x19f   :  { %v693_v42 = vadd.f32 %v657_v15, %v2016_v60  ;;  %v1006_v48 = vmul.f32 0.5, %v934_v2  ;;  %v988_v14 = vmul.f32 0.5, %v880_v52  ;;  %984 = vmatmul.f32.gmra.mxu3 %v846_v0 }
 0x1a1   :  { %v1324_v50 = vpop.eup %1323  ;;  %v729_v6 = vmul.f32 0.5, %v693_v42  ;;  %1327 = vtanh.f32 %v1006_v48 }
 0x1a2   :  { %1329 = vtanh.f32 %v988_v14  ;;  %v782_v44 = vmul.f32 0.5, %v1324_v50  ;;  %v1326_v61 = vpop.eup %1325 }
 0x1a3   :  { %1331 = vtanh.f32 %v729_v6  ;;  %v783_v29 = vmul.f32 0.5, %v1326_v61 }
 0x1a4   :  { %v556_v35 = vpop.permute.xlu1 %555  ;;  %v818_v59 = vadd.f32 0.5, %v782_v44 }
 0x1a5   :  { %v648_v24 = vmul.f32 %v1971_v12, %v556_v35  ;;  %v819_v30 = vadd.f32 0.5, %v783_v29 }
 0x1a6   :  { %900 = vmatmul.f32.gmra.mxu0 %v818_v59 }
 0x1a7   :  { %v1328_v23 = vpop.eup %1327  ;;  %v684_v53 = vadd.f32 %v648_v24, %v1968_v37 }
 0x1a8   :  { %v1330_v62 = vpop.eup %1329  ;;  %v1078_v60 = vmul.f32 0.5, %v1328_v23 }
 0x1a9   :  { %v1332_v58 = vpop.eup %1331  ;;  %v1060_v1 = vmul.f32 0.5, %v1330_v62  ;;  %v720_v19 = vmul.f32 0.5, %v684_v53 }
 0x1aa   :  { %v1114_v3 = vadd.f32 0.5, %v1078_v60  ;;  %v801_v43 = vmul.f32 0.5, %v1332_v58 }
 0x1ab   :  { %v1096_v51 = vadd.f32 0.5, %v1060_v1  ;;  %1333 = vtanh.f32 %v720_v19 }
 0x1ac   :  { %1150 = vst [vmem:[#allocation2 + $0x90] sm:$0xff] %v1114_v3  ;;  %v837_v8 = vadd.f32 0.5, %v801_v43 }
 0x1ad   :  { %1132 = vst [vmem:[#allocation2] sm:$0xff] %v1096_v51 }
 0x1ae   :  { %v937_v10 = vpop.f32.mrf.mxu2  ;;  %903 = vmatmul.f32.gmra.mxu0 %v819_v30  ;;  %957 = vmatmul.f32.gmra.mxu2 %v837_v8 }
 0x1af   :  { %v1007_v12 = vmul.f32 0.5, %v937_v10  ;;  %v883_v63 = vpop.f32.mrf.mxu0 }
 0x1b0   :  { %v989_v37 = vmul.f32 0.5, %v883_v63 }
 0x1b1   :  { %v1334_v17 = vpop.eup %1333  ;;  %1335 = vtanh.f32 %v1007_v12 }
 0x1b2   :  { %1337 = vtanh.f32 %v989_v37  ;;  %v792_v16 = vmul.f32 0.5, %v1334_v17 }
 0x1b4   :  { %v828_v31 = vadd.f32 0.5, %v792_v16 }
 0x1b6   :  { %930 = vmatmul.f32.gmra.mxu1 %v828_v31 }
 0x1b7   :  { %v1336_v28 = vpop.eup %1335 }
 0x1b8   :  { %v1338_v47 = vpop.eup %1337  ;;  %v1079_v9 = vmul.f32 0.5, %v1336_v28 }
 0x1b9   :  { %v1061_v45 = vmul.f32 0.5, %v1338_v47 }
 0x1ba   :  { %v1115_v49 = vadd.f32 0.5, %v1079_v9 }
 0x1bb   :  { %v1097_v41 = vadd.f32 0.5, %v1061_v45 }
 0x1bc   :  { %1151 = vst [vmem:[#allocation2 + $0x98] sm:$0xff] %v1115_v49 }
 0x1bd   :  { %1133 = vst [vmem:[#allocation2 + $0x8] sm:$0xff] %v1097_v41 }
 0x1be   :  { %v907_v32 = vpop.f32.mrf.mxu1 }
 0x1bf   :  { %v997_v21 = vmul.f32 0.5, %v907_v32 }
 0x1c1   :  { %1339 = vtanh.f32 %v997_v21 }
 0x1c5   :  { %v961_v33 = vpop.f32.mrf.mxu3 }
 0x1c6   :  { %v1015_v4 = vmul.f32 0.5, %v961_v33 }
 0x1c7   :  { %v1340_v34 = vpop.eup %1339 }
 0x1c8   :  { %v1069_v25 = vmul.f32 0.5, %v1340_v34  ;;  %1341 = vtanh.f32 %v1015_v4 }
 0x1ca   :  { %v1105_v55 = vadd.f32 0.5, %v1069_v25 }
 0x1cc   :  { %1141 = vst [vmem:[#allocation2 + $0x48] sm:$0xff] %v1105_v55 }
 0x1cd   :  { %v964_v22 = vpop.f32.mrf.mxu3 }
 0x1ce   :  { %v1342_v38 = vpop.eup %1341  ;;  %v1016_v39 = vmul.f32 0.5, %v964_v22 }
 0x1cf   :  { %v1087_v54 = vmul.f32 0.5, %v1342_v38  ;;  %v910_v18 = vpop.f32.mrf.mxu1 }
 0x1d0   :  { %1343 = vtanh.f32 %v1016_v39  ;;  %v998_v40 = vmul.f32 0.5, %v910_v18 }
 0x1d1   :  { %v1123_v11 = vadd.f32 0.5, %v1087_v54 }
 0x1d2   :  { %1345 = vtanh.f32 %v998_v40 }
 0x1d3   :  { %1159 = vst [vmem:[#allocation2 + $0xd8] sm:$0xff] %v1123_v11 }
 0x1d5   :  { %v967_v7 = vpop.f32.mrf.mxu3 }
 0x1d6   :  { %v1344_v46 = vpop.eup %1343  ;;  %v1017_v56 = vmul.f32 0.5, %v967_v7 }
 0x1d7   :  { %v940_v20 = vpop.f32.mrf.mxu2  ;;  %v1088_v13 = vmul.f32 0.5, %v1344_v46  ;;  %v913_v57 = vpop.f32.mrf.mxu1 }
 0x1d8   :  { %v1008_v5 = vmul.f32 0.5, %v940_v20  ;;  %v1346_v36 = vpop.eup %1345  ;;  %1347 = vtanh.f32 %v1017_v56  ;;  %v999_v26 = vmul.f32 0.5, %v913_v57 }
 0x1d9   :  { %v886_v27 = vpop.f32.mrf.mxu0  ;;  %v1124_v15 = vadd.f32 0.5, %v1088_v13  ;;  %v1070_v0 = vmul.f32 0.5, %v1346_v36 }
 0x1da   :  { %1349 = vtanh.f32 %v1008_v5  ;;  %v990_v2 = vmul.f32 0.5, %v886_v27 }
 0x1db   :  { %1351 = vtanh.f32 %v999_v26  ;;  %1160 = vst [vmem:[#allocation2 + $0xe0] sm:$0xff] %v1124_v15  ;;  %v1106_v52 = vadd.f32 0.5, %v1070_v0 }
 0x1dc   :  { %1353 = vtanh.f32 %v990_v2 }
 0x1dd   :  { %1142 = vst [vmem:[#allocation2 + $0x50] sm:$0xff] %v1106_v52  ;;  %v970_v42 = vpop.f32.mrf.mxu3 }
 0x1de   :  { %v1348_v48 = vpop.eup %1347  ;;  %v1018_v14 = vmul.f32 0.5, %v970_v42 }
 0x1df   :  { %v1089_v6 = vmul.f32 0.5, %v1348_v48  ;;  %v916_v44 = vpop.f32.mrf.mxu1 }
 0x1e0   :  { %v1350_v50 = vpop.eup %1349  ;;  %1355 = vtanh.f32 %v1018_v14  ;;  %v1000_v61 = vmul.f32 0.5, %v916_v44 }
 0x1e1   :  { %v1352_v35 = vpop.eup %1351  ;;  %v1080_v59 = vmul.f32 0.5, %v1350_v50  ;;  %v1125_v23 = vadd.f32 0.5, %v1089_v6 }
 0x1e2   :  { %v1354_v24 = vpop.eup %1353  ;;  %v1071_v53 = vmul.f32 0.5, %v1352_v35  ;;  %1357 = vtanh.f32 %v1000_v61 }
 0x1e3   :  { %v1116_v62 = vadd.f32 0.5, %v1080_v59  ;;  %v1062_v60 = vmul.f32 0.5, %v1354_v24  ;;  %1161 = vst [vmem:[#allocation2 + $0xe8] sm:$0xff] %v1125_v23 }
 0x1e4   :  { %v1107_v29 = vadd.f32 0.5, %v1071_v53 }
 0x1e5   :  { %1152 = vst [vmem:[#allocation2 + $0xa0] sm:$0xff] %v1116_v62  ;;  %v1098_v58 = vadd.f32 0.5, %v1062_v60 }
 0x1e6   :  { %1143 = vst [vmem:[#allocation2 + $0x58] sm:$0xff] %v1107_v29  ;;  %v1356_v1 = vpop.eup %1355 }
 0x1e7   :  { %1134 = vst [vmem:[#allocation2 + $0x10] sm:$0xff] %v1098_v58  ;;  %v943_v19 = vpop.f32.mrf.mxu2  ;;  %v1090_v3 = vmul.f32 0.5, %v1356_v1  ;;  %v919_v43 = vpop.f32.mrf.mxu1 }
 0x1e8   :  { %v1009_v51 = vmul.f32 0.5, %v943_v19  ;;  %v1358_v30 = vpop.eup %1357  ;;  %v1001_v8 = vmul.f32 0.5, %v919_v43 }
 0x1e9   :  { %v889_v10 = vpop.f32.mrf.mxu0  ;;  %v1126_v12 = vadd.f32 0.5, %v1090_v3  ;;  %v1072_v63 = vmul.f32 0.5, %v1358_v30 }
 0x1ea   :  { %1359 = vtanh.f32 %v1009_v51  ;;  %v991_v37 = vmul.f32 0.5, %v889_v10 }
 0x1eb   :  { %1361 = vtanh.f32 %v1001_v8  ;;  %1162 = vst [vmem:[#allocation2 + $0xf0] sm:$0xff] %v1126_v12  ;;  %v1108_v17 = vadd.f32 0.5, %v1072_v63 }
 0x1ec   :  { %1363 = vtanh.f32 %v991_v37 }
 0x1ed   :  { %1144 = vst [vmem:[#allocation2 + $0x60] sm:$0xff] %v1108_v17 }
 0x1ef   :  { %v946_v16 = vpop.f32.mrf.mxu2 }
 0x1f0   :  { %v1360_v31 = vpop.eup %1359  ;;  %v1010_v28 = vmul.f32 0.5, %v946_v16 }
 0x1f1   :  { %v1362_v47 = vpop.eup %1361  ;;  %v1081_v9 = vmul.f32 0.5, %v1360_v31 }
 0x1f2   :  { %v1364_v45 = vpop.eup %1363  ;;  %v1073_v49 = vmul.f32 0.5, %v1362_v47  ;;  %1365 = vtanh.f32 %v1010_v28 }
 0x1f3   :  { %v1117_v41 = vadd.f32 0.5, %v1081_v9  ;;  %v1063_v32 = vmul.f32 0.5, %v1364_v45 }
 0x1f4   :  { %v1109_v21 = vadd.f32 0.5, %v1073_v49 }
 0x1f5   :  { %1153 = vst [vmem:[#allocation2 + $0xa8] sm:$0xff] %v1117_v41  ;;  %v1099_v33 = vadd.f32 0.5, %v1063_v32 }
 0x1f6   :  { %1145 = vst [vmem:[#allocation2 + $0x68] sm:$0xff] %v1109_v21 }
 0x1f7   :  { %1135 = vst [vmem:[#allocation2 + $0x18] sm:$0xff] %v1099_v33  ;;  %v949_v34 = vpop.f32.mrf.mxu2  ;;  %v973_v4 = vpop.f32.mrf.mxu3 }
 0x1f8   :  { %v1366_v25 = vpop.eup %1365  ;;  %v1011_v55 = vmul.f32 0.5, %v949_v34  ;;  %v1019_v22 = vmul.f32 0.5, %v973_v4 }
 0x1f9   :  { %v1082_v38 = vmul.f32 0.5, %v1366_v25  ;;  %v892_v39 = vpop.f32.mrf.mxu0 }
 0x1fa   :  { %1367 = vtanh.f32 %v1011_v55  ;;  %v992_v54 = vmul.f32 0.5, %v892_v39 }
 0x1fb   :  { %v1118_v18 = vadd.f32 0.5, %v1082_v38  ;;  %1369 = vtanh.f32 %v1019_v22 }
 0x1fc   :  { %1371 = vtanh.f32 %v992_v54 }
 0x1fd   :  { %1154 = vst [vmem:[#allocation2 + $0xb0] sm:$0xff] %v1118_v18 }
 0x1ff   :  { %v952_v40 = vpop.f32.mrf.mxu2 }
 0x200   :  { %v1368_v11 = vpop.eup %1367  ;;  %v1012_v7 = vmul.f32 0.5, %v952_v40 }
 0x201   :  { %v1370_v46 = vpop.eup %1369  ;;  %v1083_v56 = vmul.f32 0.5, %v1368_v11  ;;  %v895_v20 = vpop.f32.mrf.mxu0 }
 0x202   :  { %v1372_v13 = vpop.eup %1371  ;;  %v1091_v57 = vmul.f32 0.5, %v1370_v46  ;;  %1373 = vtanh.f32 %v1012_v7  ;;  %v993_v5 = vmul.f32 0.5, %v895_v20 }
 0x203   :  { %v1119_v36 = vadd.f32 0.5, %v1083_v56  ;;  %v1064_v26 = vmul.f32 0.5, %v1372_v13 }
 0x204   :  { %v1127_v27 = vadd.f32 0.5, %v1091_v57  ;;  %1375 = vtanh.f32 %v993_v5 }
 0x205   :  { %1155 = vst [vmem:[#allocation2 + $0xb8] sm:$0xff] %v1119_v36  ;;  %v1100_v15 = vadd.f32 0.5, %v1064_v26 }
 0x206   :  { %1163 = vst [vmem:[#allocation2 + $0xf8] sm:$0xff] %v1127_v27 }
 0x207   :  { %1136 = vst [vmem:[#allocation2 + $0x20] sm:$0xff] %v1100_v15  ;;  %v976_v0 = vpop.f32.mrf.mxu3 }
 0x208   :  { %v1374_v2 = vpop.eup %1373  ;;  %v1020_v52 = vmul.f32 0.5, %v976_v0 }
 0x209   :  { %v1084_v42 = vmul.f32 0.5, %v1374_v2  ;;  %v898_v48 = vpop.f32.mrf.mxu0  ;;  %v922_v14 = vpop.f32.mrf.mxu1 }
 0x20a   :  { %v1376_v50 = vpop.eup %1375  ;;  %1377 = vtanh.f32 %v1020_v52  ;;  %v994_v6 = vmul.f32 0.5, %v898_v48  ;;  %v1002_v44 = vmul.f32 0.5, %v922_v14 }
 0x20b   :  { %v1120_v35 = vadd.f32 0.5, %v1084_v42  ;;  %v1065_v59 = vmul.f32 0.5, %v1376_v50 }
 0x20c   :  { %1379 = vtanh.f32 %v994_v6 }
 0x20d   :  { %1156 = vst [vmem:[#allocation2 + $0xc0] sm:$0xff] %v1120_v35  ;;  %v1101_v61 = vadd.f32 0.5, %v1065_v59  ;;  %1381 = vtanh.f32 %v1002_v44 }
 0x20f   :  { %1137 = vst [vmem:[#allocation2 + $0x28] sm:$0xff] %v1101_v61 }
 0x210   :  { %v1378_v24 = vpop.eup %1377  ;;  %v979_v23 = vpop.f32.mrf.mxu3 }
 0x211   :  { %v1092_v53 = vmul.f32 0.5, %v1378_v24  ;;  %v1021_v62 = vmul.f32 0.5, %v979_v23  ;;  %v925_v60 = vpop.f32.mrf.mxu1 }
 0x212   :  { %v1380_v29 = vpop.eup %1379  ;;  %v1003_v58 = vmul.f32 0.5, %v925_v60 }
 0x213   :  { %v1382_v1 = vpop.eup %1381  ;;  %v1128_v19 = vadd.f32 0.5, %v1092_v53  ;;  %v1066_v3 = vmul.f32 0.5, %v1380_v29  ;;  %1383 = vtanh.f32 %v1021_v62 }
 0x214   :  { %v1074_v43 = vmul.f32 0.5, %v1382_v1  ;;  %1385 = vtanh.f32 %v1003_v58 }
 0x215   :  { %1164 = vst [vmem:[#allocation2 + $0x100] sm:$0xff] %v1128_v19  ;;  %v1102_v51 = vadd.f32 0.5, %v1066_v3 }
 0x216   :  { %v1110_v30 = vadd.f32 0.5, %v1074_v43 }
 0x217   :  { %1138 = vst [vmem:[#allocation2 + $0x30] sm:$0xff] %v1102_v51 }
 0x218   :  { %1146 = vst [vmem:[#allocation2 + $0x70] sm:$0xff] %v1110_v30 }
 0x219   :  { %v1384_v8 = vpop.eup %1383  ;;  %v928_v10 = vpop.f32.mrf.mxu1 }
 0x21a   :  { %v1386_v12 = vpop.eup %1385  ;;  %v1093_v63 = vmul.f32 0.5, %v1384_v8  ;;  %v1004_v37 = vmul.f32 0.5, %v928_v10  ;;  %v982_v17 = vpop.f32.mrf.mxu3 }
 0x21b   :  { %v1075_v16 = vmul.f32 0.5, %v1386_v12  ;;  %v1022_v31 = vmul.f32 0.5, %v982_v17 }
 0x21c   :  { %v1129_v28 = vadd.f32 0.5, %v1093_v63  ;;  %1387 = vtanh.f32 %v1004_v37 }
 0x21d   :  { %v1111_v47 = vadd.f32 0.5, %v1075_v16  ;;  %1389 = vtanh.f32 %v1022_v31 }
 0x21e   :  { %1165 = vst [vmem:[#allocation2 + $0x108] sm:$0xff] %v1129_v28 }
 0x21f   :  { %1147 = vst [vmem:[#allocation2 + $0x78] sm:$0xff] %v1111_v47 }
 0x221   :  { %v955_v9 = vpop.f32.mrf.mxu2 }
 0x222   :  { %v1388_v45 = vpop.eup %1387  ;;  %v1013_v49 = vmul.f32 0.5, %v955_v9  ;;  %v985_v41 = vpop.f32.mrf.mxu3 }
 0x223   :  { %v1390_v32 = vpop.eup %1389  ;;  %v1076_v21 = vmul.f32 0.5, %v1388_v45  ;;  %v1023_v33 = vmul.f32 0.5, %v985_v41  ;;  %v901_v34 = vpop.f32.mrf.mxu0 }
 0x224   :  { %v1094_v4 = vmul.f32 0.5, %v1390_v32  ;;  %1391 = vtanh.f32 %v1013_v49  ;;  %v995_v25 = vmul.f32 0.5, %v901_v34 }
 0x225   :  { %v1112_v55 = vadd.f32 0.5, %v1076_v21  ;;  %1393 = vtanh.f32 %v1023_v33 }
 0x226   :  { %v1130_v22 = vadd.f32 0.5, %v1094_v4  ;;  %1395 = vtanh.f32 %v995_v25 }
 0x227   :  { %1148 = vst [vmem:[#allocation2 + $0x80] sm:$0xff] %v1112_v55 }
 0x228   :  { %1166 = vst [vmem:[#allocation2 + $0x110] sm:$0xff] %v1130_v22 }
 0x22a   :  { %v1392_v38 = vpop.eup %1391 }
 0x22b   :  { %v1394_v39 = vpop.eup %1393  ;;  %v1085_v54 = vmul.f32 0.5, %v1392_v38  ;;  %v904_v18 = vpop.f32.mrf.mxu0 }
 0x22c   :  { %v1396_v40 = vpop.eup %1395  ;;  %v1095_v11 = vmul.f32 0.5, %v1394_v39  ;;  %v996_v7 = vmul.f32 0.5, %v904_v18 }
 0x22d   :  { %v1121_v46 = vadd.f32 0.5, %v1085_v54  ;;  %v1067_v56 = vmul.f32 0.5, %v1396_v40 }
 0x22e   :  { %v1131_v20 = vadd.f32 0.5, %v1095_v11  ;;  %1397 = vtanh.f32 %v996_v7 }
 0x22f   :  { %1157 = vst [vmem:[#allocation2 + $0xc8] sm:$0xff] %v1121_v46  ;;  %v1103_v13 = vadd.f32 0.5, %v1067_v56 }
 0x230   :  { %1167 = vst [vmem:[#allocation2 + $0x118] sm:$0xff] %v1131_v20 }
 0x231   :  { %1139 = vst [vmem:[#allocation2 + $0x38] sm:$0xff] %v1103_v13  ;;  %v958_v57 = vpop.f32.mrf.mxu2 }
 0x232   :  { %v1014_v5 = vmul.f32 0.5, %v958_v57 }
 0x233   :  { %v931_v36 = vpop.f32.mrf.mxu1 }
 0x234   :  { %v1398_v26 = vpop.eup %1397  ;;  %1399 = vtanh.f32 %v1014_v5  ;;  %v1005_v27 = vmul.f32 0.5, %v931_v36 }
 0x235   :  { %v1068_v15 = vmul.f32 0.5, %v1398_v26 }
 0x236   :  { %1401 = vtanh.f32 %v1005_v27 }
 0x237   :  { %v1104_v0 = vadd.f32 0.5, %v1068_v15 }
 0x239   :  { %1140 = vst [vmem:[#allocation2 + $0x40] sm:$0xff] %v1104_v0 }
 0x23a   :  { %v1400_v2 = vpop.eup %1399 }
 0x23b   :  { %v1086_v52 = vmul.f32 0.5, %v1400_v2 }
 0x23c   :  { %v1402_v42 = vpop.eup %1401 }
 0x23d   :  { %v1122_v48 = vadd.f32 0.5, %v1086_v52  ;;  %v1077_v14 = vmul.f32 0.5, %v1402_v42 }
 0x23f   :  { %1158 = vst [vmem:[#allocation2 + $0xd0] sm:$0xff] %v1122_v48  ;;  %v1113_v50 = vadd.f32 0.5, %v1077_v14 }
 0x241   :  { %1149 = vst [vmem:[#allocation2 + $0x88] sm:$0xff] %v1113_v50 }
 0x242   :  { %1180 = dma.vmem_to_hbm [thread:$0]  %s1173_s6, 4608, %s1175_s9, [#allocation3], %s1433_s10, %s1433_s10, %s1434_s11  }
 0x243   :  { %1427 = dma.done.wait [#allocation3], 4608  }
 0x244   :  { %1428 = vsyncadd [#allocation3], 4294962688 }
 0x245   :  { %1185 = vsyncpa [#allocation3], 1 }

</bundles_post_ra>
